<compile_context>
chip_gen: v7x
topology: tpu7x:2x2x1
jax: 0.10.0
libtpu: 0.0.40
codegen_flags: <defaults>
</compile_context>

<pallas_src>
import functools

import jax
import jax.numpy as jnp
from jax.experimental import pallas as pl
from jax.experimental.pallas import tpu as pltpu


def _round_up(x: int, m: int) -> int:
    return ((x + m - 1) // m) * m


def _largest_aligned_divisor(total: int, align: int, cap: int) -> int:
    """Largest t with: t % align == 0, t divides `total`, t <= cap.

    `total` is assumed to be a multiple of `align`.
    """
    m = total // align
    max_d = max(1, cap // align)
    best = 1
    for d in range(1, max_d + 1):
        if m % d == 0:
            best = d
    return best * align


def _apply_activation(y, activation):
    if activation == "relu":
        return jnp.maximum(y, 0.0)
    if activation == "sigmoid":
        return jax.nn.sigmoid(y)
    return y  # activation is None -> plain Linear


def _mlp_kernel_single_k(x_ref, w_ref, b_ref, o_ref, *, activation):
    # Whole reduction in one step: no scratch, bias + activation fused into
    # the store (saves a full tm x tn f32 VMEM round trip per output tile).
    y = jnp.dot(x_ref[...], w_ref[...], preferred_element_type=jnp.float32)
    y = y + b_ref[...].astype(jnp.float32)
    o_ref[...] = _apply_activation(y, activation).astype(o_ref.dtype)


def _mlp_kernel_multi_k(x_ref, w_ref, b_ref, o_ref, acc_ref, *, activation):
    k = pl.program_id(2)

    @pl.when(k == 0)
    def _init():
        # Fold the bias into the accumulator init.
        acc_ref[...] = jnp.broadcast_to(
            b_ref[...].astype(jnp.float32), acc_ref.shape
        )

    acc_ref[...] += jnp.dot(
        x_ref[...], w_ref[...], preferred_element_type=jnp.float32
    )

    @pl.when(k == pl.num_programs(2) - 1)
    def _finalize():
        o_ref[...] = _apply_activation(acc_ref[...], activation).astype(o_ref.dtype)


def prepare_mlp_params(weight, bias, *, compute_dtype=jnp.bfloat16):
    """Pad + cast the PyTorch-layout weight (out, in) and bias ONCE.

    Hoists the per-call weight padding out of the hot path (per review:
    per-call jnp.pad of W roughly doubles HBM traffic for a mem-bound layer).
    """
    c_out, c_in = weight.shape
    k_p = _round_up(c_in, 128)
    o_p = _round_up(c_out, 128)
    w_t = jnp.asarray(weight).T.astype(compute_dtype)          # (C_in, C_out)
    w_pad = jnp.pad(w_t, ((0, k_p - c_in), (0, o_p - c_out)))   # (k_p, o_p)
    b_pad = jnp.pad(jnp.asarray(bias, jnp.float32), (0, o_p - c_out)).reshape(1, o_p)
    return w_pad, b_pad, c_in, c_out


def mlp_forward(x, params, *, activation="relu", compute_dtype=jnp.bfloat16,
                tm_max=512, tn_max=512, tk_max=2048,
                vmem_budget=30 * 1024 * 1024):
    """MLP forward: activation(x @ W.T + b), params from prepare_mlp_params."""
    w_pad, b_pad, c_in, c_out = params
    k_p, o_p = w_pad.shape

    orig_shape = x.shape
    x2 = x.reshape(-1, c_in)
    n = x2.shape[0]

    in_bytes = jnp.dtype(compute_dtype).itemsize
    out_bytes = jnp.dtype(x.dtype).itemsize

    # ---------------- tile plan ----------------
    # tn divides o_p (multiple of 128, lane-dense output); tm is rows (mult of 8).
    tn = _largest_aligned_divisor(o_p, 128, min(tn_max, o_p))
    tm = min(tm_max, _round_up(n, 8))

    def fits(tm_, tn_, tk_, multi_k):
        # Everything BlockSpec'd is double-buffered; accumulator is single.
        tiles = 2 * ((tm_ * tk_ + tk_ * tn_) * in_bytes + tn_ * 4
                     + tm_ * tn_ * out_bytes)
        if multi_k:
            tiles += tm_ * tn_ * 4
        return tiles <= vmem_budget

    # Prefer collapsing K (tk == k_p): the weight slab stays resident in VMEM
    # across row tiles and no accumulator scratch is needed.
    tk = k_p
    while not fits(tm, tn, tk, multi_k=False) and tn > 128:
        tn = _largest_aligned_divisor(o_p, 128, tn - 128)
    while not fits(tm, tn, tk, multi_k=False) and tm > 128:
        tm = max(128, _round_up(tm // 2, 8))
    single_k = fits(tm, tn, tk, multi_k=False)
    if not single_k:
        # Split the reduction; fall back to the accumulator kernel.
        tk = _largest_aligned_divisor(k_p, 128, min(tk_max, k_p))
        while not fits(tm, tn, tk, multi_k=True) and tk > 128:
            tk = _largest_aligned_divisor(k_p, 128, tk - 128)

    n_p = _round_up(n, tm)

    # v7x megacore: make sure the (i, j) grid has >= 2 tiles so both
    # TensorCores get work (costs ~nothing on v5e/v6e).
    if (n_p // tm) * (o_p // tn) == 1 and tm >= 16:
        tm = _round_up(tm // 2, 8)
        n_p = _round_up(n, tm)

    grid_i = n_p // tm
    grid_j = o_p // tn
    grid_k = k_p // tk

    # Outer-axis dispatch: j-outer re-streams X (grid_j) times (W resident);
    # i-outer re-streams W (grid_i) times (X resident). Pick the cheaper one.
    x_bytes = n_p * k_p * in_bytes
    w_bytes = k_p * o_p * in_bytes
    j_outer = x_bytes * (grid_j - 1) <= w_bytes * (grid_i - 1)

    # ---------------- per-call x prep (cheap: only x, not the weights) ------
    x_pad = x2.astype(compute_dtype)
    if n_p != n or k_p != c_in:
        x_pad = jnp.pad(x_pad, ((0, n_p - n), (0, k_p - c_in)))

    # ---------------- kernel / specs ----------------
    if single_k:
        kernel = functools.partial(_mlp_kernel_single_k, activation=activation)
        if j_outer:
            grid = (grid_j, grid_i)
            x_map = lambda j, i: (i, 0)
            w_map = lambda j, i: (0, j)   # constant across inner i -> resident
            b_map = lambda j, i: (0, j)
            o_map = lambda j, i: (i, j)
        else:
            grid = (grid_i, grid_j)
            x_map = lambda i, j: (i, 0)   # constant across inner j -> resident
            w_map = lambda i, j: (0, j)
            b_map = lambda i, j: (0, j)
            o_map = lambda i, j: (i, j)
        dims = ("parallel", "parallel")
        scratch = []
    else:
        kernel = functools.partial(_mlp_kernel_multi_k, activation=activation)
        if j_outer:
            grid = (grid_j, grid_i, grid_k)
            x_map = lambda j, i, k: (i, k)
            w_map = lambda j, i, k: (k, j)
            b_map = lambda j, i, k: (0, j)
            o_map = lambda j, i, k: (i, j)
        else:
            grid = (grid_i, grid_j, grid_k)
            x_map = lambda i, j, k: (i, k)
            w_map = lambda i, j, k: (k, j)
            b_map = lambda i, j, k: (0, j)
            o_map = lambda i, j, k: (i, j)
        dims = ("parallel", "parallel", "arbitrary")
        scratch = [pltpu.VMEM((tm, tn), jnp.float32)]

    cost = pl.CostEstimate(
        flops=2 * n_p * k_p * o_p,
        transcendentals=(n_p * o_p if activation == "sigmoid" else 0),
        bytes_accessed=(n_p * k_p * in_bytes + k_p * o_p * in_bytes
                        + o_p * 4 + n_p * o_p * out_bytes),
    )

    out_pad = pl.pallas_call(
        kernel,
        out_shape=jax.ShapeDtypeStruct((n_p, o_p), x.dtype),
        grid_spec=pltpu.PrefetchScalarGridSpec(
            num_scalar_prefetch=0,
            grid=grid,
            in_specs=[
                pl.BlockSpec((tm, tk), x_map),   # x tile
                pl.BlockSpec((tk, tn), w_map),   # w tile
                pl.BlockSpec((1, tn), b_map),    # bias tile
            ],
            out_specs=pl.BlockSpec((tm, tn), o_map),
            scratch_shapes=scratch,
        ),
        compiler_params=pltpu.CompilerParams(
            dimension_semantics=dims,
            vmem_limit_bytes=40 * 1024 * 1024,
        ),
        cost_estimate=cost,
    )(x_pad, w_pad, b_pad)

    out = out_pad[:n, :c_out]
    return out.reshape(orig_shape[:-1] + (c_out,))


if __name__ == "__main__":
    # Small shapes consistent with the module's forward: (batch, input_channels)
    batch = 8
    input_channels = 32
    output_channels = 64

    key = jax.random.PRNGKey(0)
    kx, kw, kb = jax.random.split(key, 3)

    # Parameter init mimicking torch.nn.Linear (uniform +/- 1/sqrt(fan_in)),
    # weight in PyTorch layout (out, in).
    bound = 1.0 / jnp.sqrt(float(input_channels))
    weight = jax.random.uniform(
        kw, (output_channels, input_channels), jnp.float32, -bound, bound
    )
    bias = jax.random.uniform(kb, (output_channels,), jnp.float32, -bound, bound)
    x = jax.random.normal(kx, (batch, input_channels), jnp.float32)

    ref = jnp.maximum(x @ weight.T + bias, 0.0)

    # f32 compute path: exact vs the plain-JAX reference.
    params_f32 = prepare_mlp_params(weight, bias, compute_dtype=jnp.float32)
    out = jax.block_until_ready(
        mlp_forward(x, params_f32, activation="relu", compute_dtype=jnp.float32)
    )
    assert out.shape == (batch, output_channels)
    assert jnp.allclose(out, ref, atol=1e-5, rtol=1e-5)

    # Default bf16-compute path (half HBM traffic, native MXU rate, f32 acc).
    params_bf16 = prepare_mlp_params(weight, bias)  # bf16 default
    out_bf16 = jax.block_until_ready(
        mlp_forward(x, params_bf16, activation="relu")
    )
    assert jnp.allclose(out_bf16, ref, atol=2e-2, rtol=2e-2)

    # Larger multi-tile shape exercising the grid, axis-order dispatch,
    # padding path, and the sigmoid branch of the module.
    kx2, kw2, kb2 = jax.random.split(jax.random.PRNGKey(1), 3)
    big_n, big_in, big_out = 384, 320, 512
    bound2 = 1.0 / jnp.sqrt(float(big_in))
    w2 = jax.random.uniform(kw2, (big_out, big_in), jnp.float32, -bound2, bound2)
    b2 = jax.random.uniform(kb2, (big_out,), jnp.float32, -bound2, bound2)
    x2 = jax.random.normal(kx2, (big_n, big_in), jnp.float32)
    params2 = prepare_mlp_params(w2, b2, compute_dtype=jnp.float32)
    out2 = jax.block_until_ready(
        mlp_forward(x2, params2, activation="sigmoid", compute_dtype=jnp.float32)
    )
    ref2 = jax.nn.sigmoid(x2 @ w2.T + b2)
    assert jnp.allclose(out2, ref2, atol=1e-4, rtol=1e-4)

    print("KERNEL_OK")
</pallas_src>

<mosaic_0001>
module attributes {stable_mosaic.version = 11 : i64} {
  func.func @_mlp_kernel_single_k(%arg0: i32, %arg1: i32, %arg2: memref<8x128xf32, #tpu.memory_space<vmem>>, %arg3: memref<128x128xf32, #tpu.memory_space<vmem>>, %arg4: memref<1x128xf32, #tpu.memory_space<vmem>>, %arg5: memref<8x128xf32, #tpu.memory_space<vmem>>) attributes {dimension_semantics = [#tpu.dimension_semantics<parallel>, #tpu.dimension_semantics<parallel>], iteration_bounds = array<i64: 1, 1>, scalar_prefetch = 0 : i64, scratch_operands = 0 : i64, tpu.core_type = #tpu.core_type<tc>, window_params = [{transform_indices = @transform_0, window_bounds = array<i64: 8, 128>}, {transform_indices = @transform_1, window_bounds = array<i64: 128, 128>}, {transform_indices = @transform_2, window_bounds = array<i64: 1, 128>}, {transform_indices = @transform_3, window_bounds = array<i64: 8, 128>}]} {
    %c0 = arith.constant 0 : index
    %c0_0 = arith.constant 0 : index
    %0 = vector.load %arg2[%c0, %c0_0] : memref<8x128xf32, #tpu.memory_space<vmem>>, vector<8x128xf32>
    %c0_1 = arith.constant 0 : index
    %c0_2 = arith.constant 0 : index
    %1 = vector.load %arg3[%c0_1, %c0_2] : memref<128x128xf32, #tpu.memory_space<vmem>>, vector<128x128xf32>
    %cst = arith.constant dense<0.000000e+00> : vector<8x128xf32>
    %2 = tpu.matmul %0, %1, %cst {dimension_numbers = #tpu.dot_dimension_numbers<[1], [0], [0], [1], [0, 0, 1, 1], [], []>} : vector<8x128xf32>, vector<128x128xf32>, vector<8x128xf32> -> vector<8x128xf32>
    %c0_3 = arith.constant 0 : index
    %c0_4 = arith.constant 0 : index
    %3 = vector.load %arg4[%c0_3, %c0_4] : memref<1x128xf32, #tpu.memory_space<vmem>>, vector<1x128xf32>
    %4 = vector.broadcast %3 : vector<1x128xf32> to vector<8x128xf32>
    %5 = arith.addf %2, %4 : vector<8x128xf32>
    %cst_5 = arith.constant 0.000000e+00 : f32
    %6 = vector.broadcast %cst_5 : f32 to vector<8x128xf32>
    %7 = arith.maximumf %5, %6 : vector<8x128xf32>
    %c0_6 = arith.constant 0 : index
    %c0_7 = arith.constant 0 : index
    %8 = vector.load %arg5[%c0_6, %c0_7] : memref<8x128xf32, #tpu.memory_space<vmem>>, vector<8x128xf32>
    tpu.vector_store %arg5[%c0_6, %c0_7], %7 {strides = array<i32>} : memref<8x128xf32, #tpu.memory_space<vmem>>, vector<8x128xf32>,
    return
  }
  func.func @transform_0(%arg0: i32, %arg1: i32) -> (i32, i32) {
    %c0_i32 = arith.constant 0 : i32
    %c0_i32_0 = arith.constant 0 : i32
    return %arg1, %c0_i32 : i32, i32
  }
  func.func @transform_1(%arg0: i32, %arg1: i32) -> (i32, i32) {
    %c0_i32 = arith.constant 0 : i32
    %c0_i32_0 = arith.constant 0 : i32
    return %c0_i32, %arg0 : i32, i32
  }
  func.func @transform_2(%arg0: i32, %arg1: i32) -> (i32, i32) {
    %c0_i32 = arith.constant 0 : i32
    %c0_i32_0 = arith.constant 0 : i32
    return %c0_i32, %arg0 : i32, i32
  }
  func.func @transform_3(%arg0: i32, %arg1: i32) -> (i32, i32) {
    %c0_i32 = arith.constant 0 : i32
    return %arg1, %arg0 : i32, i32
  }
}

</mosaic_0001>

<bundles_post_ra>
// kernel: tpu_custom_call.1
= control target key start
LH: loop header
LB: loop body
LE: loop exit
PB: predicated region body
PF: predicated region fallthrough
CT: control target
= control target key end

     0   :  { %8 = vsyncpa [#allocation3], 0  ;;  %s384_s0 = inlined_call_operand.hbm [shape: f32[8,128], index: 0, kind: input, shape index: {}]   ;;  %s385_s1 = inlined_call_operand.hbm [shape: f32[128,128], index: 1, kind: input, shape index: {}]   ;;  %s386_s2 = inlined_call_operand.vmem [shape: f32[1,128], index: 2, kind: input, shape index: {}]   ;;  %s387_s3 = inlined_call_operand.hbm [shape: f32[8,128], index: 3, kind: output, shape index: {}]  }
   0x1   :  { %9 = vsyncpa [#allocation6], 0 }
   0x2   :  { %10 = vsyncpa [#allocation4], 0  ;;  %s310_s12 = smov [#allocation2]   ;;  %s311_s14 = smov [#allocation5]  }
   0x3   :  { %s17_s13 = sshll.u32 %s310_s12, 4  ;;  %s26_s15 = sshll.u32 %s311_s14, 4  ;;  %s18_s13 = int_to_ptr.vmem [resolvable:$true] %s17_s13  ;;  %s338_s15 = int_to_ptr.vmem [resolvable:$true] %s26_s15 }
   0x4   :  { %s238_s18 = scalar_lea.hbm %s384_s0, 128 }
   0x5   :  { %p239_p0 = scmp.ne.s32.totalorder %s384_s0, %s238_s18  ;;  %p242_p1 = scmp.lt.u32.totalorder %s238_s18, %s384_s0 }
   0x7   :  { %p244_p2 = pnand %p242_p1, %p239_p0 }
   0x9   :  { %247 = shalt.err (!%p244_p2)
}
   0xa   :  { %s248_s23 = scalar_lea.vmem %s18_s13, 128  ;;  %p253_p4 = scmp.lt.s32.totalorder %s18_s13, %s18_s13 }
   0xb   :  { %p249_p3 = scmp.ne.s32.totalorder %s18_s13, %s248_s23  ;;  %p254_p5 = scmp.lt.s32.totalorder %s248_s23, %s248_s23 }
   0xd   :  { %p255_p6 = por %p254_p5, %p253_p4 }
   0xf   :  { %p256_p7 = pnand %p255_p6, %p249_p3 }
  0x11   :  { %259 = shalt.err (!%p256_p7)
}
  0x12   :  { %20 = dma.hbm_to_vmem [thread:$0]  %s384_s0, 128, %s18_s13, [#allocation3]  }
  0x13   :  { %s260_s28 = scalar_lea.hbm %s385_s1, 2048 }
  0x14   :  { %p261_p8 = scmp.ne.s32.totalorder %s385_s1, %s260_s28  ;;  %p264_p9 = scmp.lt.u32.totalorder %s260_s28, %s385_s1 }
  0x16   :  { %p266_p10 = pnand %p264_p9, %p261_p8 }
  0x18   :  { %269 = shalt.err (!%p266_p10)
}
  0x19   :  { %s270_s6 = scalar_lea.vmem %s338_s15, 2048  ;;  %p275_p12 = scmp.lt.s32.totalorder %s338_s15, %s338_s15 }
  0x1a   :  { %p271_p11 = scmp.ne.s32.totalorder %s338_s15, %s270_s6  ;;  %p276_p13 = scmp.lt.s32.totalorder %s270_s6, %s270_s6 }
  0x1c   :  { %p277_p0 = por %p276_p13, %p275_p12 }
  0x1e   :  { %p278_p1 = pnand %p277_p0, %p271_p11 }
  0x20   :  { %281 = shalt.err (!%p278_p1)
}
  0x21   :  { %s312_s0 = smov 128   ;;  %s313_s7 = smov 8  }
  0x22   :  { %32 = dma.hbm_to_vmem [thread:$0]  %s385_s1, 2048, %s338_s15, [#allocation6], %s312_s0, %s312_s0, %s313_s7  }
  0x23   :  { %304 = dma.done.wait [#allocation3], 128  }
  0x24   :  { %305 = vsyncadd [#allocation3], 4294967168 }
  0x25   :  { %306 = dma.done.wait [#allocation6], 2048  }
  0x26   :  { %307 = vsyncadd [#allocation6], 4294965248  ;;  %v314_v0 = vmov 0.0|0.0   ;;  %vm315_vm0 = vmmov 0   ;;  %v316_v1 = vmov 0.0   ;;  %v42_v2 = vld [vmem:[#allocation5] sm:$0xff] }
  0x27   :  { %206 = vmatprep.subr.bf16.mxu0 %v314_v0  ;;  %203 = vmatprep.mubr.msk.f32.mxu0 %vm315_vm0, %v316_v1  ;;  %v43_v3 = vld [vmem:[#allocation5 + $0x8] sm:$0xff]  ;;  %v44_v4 = vld [vmem:[#allocation5 + $0x10] sm:$0xff]  ;;  %v45_v6 = vld [vmem:[#allocation5 + $0x18] sm:$0xff]  ;;  %s317_s11 = smov [#allocation7]  }
  0x28   :  { %v207_v5 = vpack.c.bf16 %v43_v3, %v42_v2  ;;  %v210_v7 = vpack.c.bf16 %v45_v6, %v44_v4  ;;  %v46_v8 = vld [vmem:[#allocation5 + $0x20] sm:$0xff]  ;;  %v47_v9 = vld [vmem:[#allocation5 + $0x28] sm:$0xff]  ;;  %v48_v11 = vld [vmem:[#allocation5 + $0x30] sm:$0xff]  ;;  %s143_s12 = sshll.u32 %s317_s11, 4  ;;  %s144_s12 = int_to_ptr.vmem [resolvable:$true] %s143_s12 }
  0x29   :  { %v213_v10 = vpack.c.bf16 %v47_v9, %v46_v8  ;;  %v49_v12 = vld [vmem:[#allocation5 + $0x38] sm:$0xff]  ;;  %v50_v14 = vld [vmem:[#allocation5 + $0x40] sm:$0xff]  ;;  %v51_v15 = vld [vmem:[#allocation5 + $0x48] sm:$0xff]  ;;  %s282_s13 = scalar_lea.vmem %s144_s12, 128  ;;  %p287_p3 = scmp.lt.s32.totalorder %s144_s12, %s144_s12 }
  0x2a   :  { %208 = vmatpush3.bf16.msra.mxu0 %v207_v5  ;;  %v216_v13 = vpack.c.bf16 %v49_v12, %v48_v11  ;;  %v219_v16 = vpack.c.bf16 %v51_v15, %v50_v14  ;;  %v52_v17 = vld [vmem:[#allocation5 + $0x50] sm:$0xff]  ;;  %v53_v18 = vld [vmem:[#allocation5 + $0x58] sm:$0xff]  ;;  %v54_v20 = vld [vmem:[#allocation5 + $0x60] sm:$0xff]  ;;  %p283_p2 = scmp.ne.s32.totalorder %s144_s12, %s282_s13  ;;  %p288_p4 = scmp.lt.s32.totalorder %s282_s13, %s282_s13 }
  0x2b   :  { %209 = vmatprep.subr.bf16.mxu0 %v314_v0  ;;  %v222_v19 = vpack.c.bf16 %v53_v18, %v52_v17  ;;  %v55_v21 = vld [vmem:[#allocation5 + $0x68] sm:$0xff]  ;;  %v56_v23 = vld [vmem:[#allocation5 + $0x70] sm:$0xff]  ;;  %v57_v24 = vld [vmem:[#allocation5 + $0x78] sm:$0xff] }
  0x2c   :  { %v225_v22 = vpack.c.bf16 %v55_v21, %v54_v20  ;;  %v228_v25 = vpack.c.bf16 %v57_v24, %v56_v23  ;;  %v41_v26 = vld [vmem:[#allocation2] sm:$0xff]  ;;  %p289_p5 = por %p288_p4, %p287_p3 }
  0x2d   :  { %v153_v27 = vld [vmem:[%s386_s2] ss:$0 sm:$0xff] }
  0x2e   :  { %211 = vmatpush3.bf16.msra.mxu0 %v210_v7  ;;  %p290_p6 = pnand %p289_p5, %p283_p2 }
  0x2f   :  { %212 = vmatprep.subr.bf16.mxu0 %v314_v0 }
  0x32   :  { %214 = vmatpush3.bf16.msra.mxu0 %v213_v10 }
  0x33   :  { %215 = vmatprep.subr.bf16.mxu0 %v314_v0 }
  0x36   :  { %217 = vmatpush3.bf16.msra.mxu0 %v216_v13 }
  0x37   :  { %218 = vmatprep.subr.bf16.mxu0 %v314_v0 }
  0x3a   :  { %220 = vmatpush3.bf16.msra.mxu0 %v219_v16 }
  0x3b   :  { %221 = vmatprep.subr.bf16.mxu0 %v314_v0 }
  0x3e   :  { %223 = vmatpush3.bf16.msra.mxu0 %v222_v19 }
  0x3f   :  { %224 = vmatprep.subr.bf16.mxu0 %v314_v0 }
  0x42   :  { %226 = vmatpush3.bf16.msra.mxu0 %v225_v22 }
  0x43   :  { %227 = vmatprep.subr.bf16.mxu0 %v314_v0 }
  0x46   :  { %229 = vmatpush3.bf16.msra.mxu0 %v228_v25 }
  0x49   :  { %204 = vmatmul.mubr.f32.vlgmr.msra.gmra.mrb[0].mxu0 %v41_v26 }
 0x11c   :  { %v131_v28 = vpop.f32.mrb[0].mxu0 }
 0x11d   :  { %v132_v29 = vadd.f32 %v153_v27, %v131_v28  ;;  %v205_v30 = vpop.f32.mrb[1].mxu0 }
 0x11f   :  { %v135_v31 = vmax.f32 %v132_v29, 0.0 }
 0x121   :  { %136 = vst [vmem:[#allocation7] sm:$0xff] %v135_v31 }
 0x122   :  { %293 = shalt.err (!%p290_p6)
}
 0x123   :  { %s294_s16 = scalar_lea.hbm %s387_s3, 128 }
 0x124   :  { %p295_p7 = scmp.ne.s32.totalorder %s387_s3, %s294_s16  ;;  %p298_p8 = scmp.lt.u32.totalorder %s294_s16, %s387_s3 }
 0x126   :  { %p300_p9 = pnand %p298_p8, %p295_p7 }
 0x128   :  { %303 = shalt.err (!%p300_p9)
}
 0x129   :  { %146 = dma.vmem_to_hbm [thread:$0]  %s144_s12, 128, %s387_s3, [#allocation4]  }
 0x12a   :  { %308 = dma.done.wait [#allocation4], 128  }
 0x12b   :  { %309 = vsyncadd [#allocation4], 4294967168 }
 0x12c   :  { %150 = vsyncpa [#allocation3], 1 }
 0x12d   :  { %151 = vsyncpa [#allocation6], 1 }
 0x12e   :  { %152 = vsyncpa [#allocation4], 1 }

</bundles_post_ra>
